<compile_context>
chip_gen: v7x
topology: tpu7x:2x2x1
jax: 0.10.0
libtpu: 0.0.40
codegen_flags: <defaults>
</compile_context>

<pallas_src>
import numpy as np
import jax
import jax.numpy as jnp
from jax.experimental import pallas as pl
from jax.experimental.pallas import tpu as pltpu

K2_PAD = 128        # packed pooled-lane axis: 1+4+9+36 = 50 useful lanes, padded to one lane tile
NEG_MASK = -1e30    # additive mask so ReLU zeroes off-branch / padding lanes exactly


# ---------------------------------------------------------------------------
# Fused Pallas kernel: all four pyramid branches + concat, one batch element.
# ---------------------------------------------------------------------------
def psp_fused_kernel(x_ref, pt_ref, w_ref, bias_ref, ut_ref, out_ref):
    C, _ = x_ref.shape
    x = x_ref[...]                                        # (C, HW)  f32, straight from HBM
    # Fused torch.cat: identity rows, written untouched (bit-exact f32).
    out_ref[:C, :] = x.astype(out_ref.dtype)
    # Matmul 1: all four adaptive average pools at once (bf16 MXU, f32 accum).
    pooled = jnp.dot(x.astype(jnp.bfloat16), pt_ref[...],
                     preferred_element_type=jnp.float32)  # (C, K2_PAD)
    # Matmul 2: four BN-scale-folded 1x1 convs, row-stacked.
    y = jnp.dot(w_ref[...], pooled.astype(jnp.bfloat16),
                preferred_element_type=jnp.float32)       # (4*Co, K2_PAD)
    # BN bias + ReLU.  NOTE: bias_ref holds NEG_MASK on off-branch / padding lanes;
    # this add MUST stay in f32 and happen BEFORE any bf16 downcast so ReLU zeroes
    # those lanes exactly (no mask leakage through the packed upsample matrix).
    z = jnp.maximum(y + bias_ref[...], 0.0)               # (4*Co, K2_PAD)
    # Matmul 3: all four bilinear (align_corners=True) upsamples at once.
    feat = jnp.dot(z.astype(jnp.bfloat16), ut_ref[...],
                   preferred_element_type=jnp.float32)    # (4*Co, HW)
    out_ref[C:, :] = feat.astype(out_ref.dtype)


# ---------------------------------------------------------------------------
# Exact AdaptiveAvgPool2d / bilinear(align_corners=True) matrices.
# ---------------------------------------------------------------------------
def adaptive_avg_matrix(out_size, in_size):
    m = np.zeros((out_size, in_size), dtype=np.float32)
    for i in range(out_size):
        start = (i * in_size) // out_size
        end = -((-(i + 1) * in_size) // out_size)  # ceil((i+1)*in/out)
        m[i, start:end] = 1.0 / (end - start)
    return m


def bilinear_up_matrix(out_size, in_size):
    # mode='bilinear', align_corners=True
    m = np.zeros((out_size, in_size), dtype=np.float32)
    if in_size == 1:
        m[:, 0] = 1.0
        return m
    scale = (in_size - 1) / (out_size - 1) if out_size > 1 else 0.0
    for h in range(out_size):
        src = h * scale
        i0 = min(int(np.floor(src)), in_size - 1)
        i1 = min(i0 + 1, in_size - 1)
        frac = src - i0
        m[h, i0] += 1.0 - frac
        m[h, i1] += frac
    return m


def build_packed_operands(params, pool_sizes, H, W, hw_pad):
    """Pack the 4 branches: PT (HWp,128), UT (128,HWp), W_all (4*Co,Ci), bias_mat (4*Co,128)."""
    HW = H * W
    C_out = params[0][0].shape[0]
    k2s = [k * k for k in pool_sizes]
    assert sum(k2s) <= K2_PAD
    offs = np.cumsum([0] + k2s[:-1])

    pt_all = np.zeros((hw_pad, K2_PAD), np.float32)   # padded spatial rows stay 0
    ut_all = np.zeros((K2_PAD, hw_pad), np.float32)   # padded spatial cols stay 0
    bias_mat = jnp.full((len(pool_sizes) * C_out, K2_PAD), NEG_MASK, jnp.float32)
    w_rows = []
    for i, k in enumerate(pool_sizes):
        ph = adaptive_avg_matrix(k, H)
        pw = adaptive_avg_matrix(k, W)
        uh = bilinear_up_matrix(H, k)
        uw = bilinear_up_matrix(W, k)
        p = np.kron(ph, pw)              # (k*k, HW): pooled = p @ x_row
        u = np.kron(uh, uw)              # (HW, k*k): upsampled = u @ pooled
        off, k2 = int(offs[i]), k2s[i]
        pt_all[:HW, off:off + k2] = p.T
        ut_all[off:off + k2, :HW] = u.T

        w, scale, bias = params[i]
        w_rows.append(scale * w)         # fold BN(eval) scale into the 1x1 conv weight
        bias_mat = bias_mat.at[i * C_out:(i + 1) * C_out, off:off + k2].set(
            jnp.broadcast_to(bias, (C_out, k2)))

    w_all = jnp.concatenate(w_rows, axis=0)             # (4*C_out, C_in)
    return jnp.asarray(pt_all), jnp.asarray(ut_all), w_all, bias_mat


def pyramid_pooling(x, params, pool_sizes=(1, 2, 3, 6)):
    N, C, H, W = x.shape
    HW = H * W
    HW_pad = ((HW + 127) // 128) * 128   # lane-dense output stores
    C_out = params[0][0].shape[0]
    nb = len(pool_sizes)
    C_total = C + nb * C_out
    assert C % 8 == 0, "in-kernel concat writes assume a sublane-aligned channel count"

    pt, ut, w_all, bias_mat = build_packed_operands(params, pool_sizes, H, W, HW_pad)
    # bf16 for the big MXU operands; f32 accumulation inside the kernel.
    # TODO(synk): keep PT/UT in f32 (non-bf16 MXU path) if bit-closer PyTorch parity is needed.
    pt = pt.astype(jnp.bfloat16)
    ut = ut.astype(jnp.bfloat16)
    w_all = w_all.astype(jnp.bfloat16)

    # x stays f32 (minor-dim-merge reshape is free); bf16 cast happens in-kernel.
    x_flat = x.reshape(N, C, HW)
    if HW_pad != HW:
        x_flat = jnp.pad(x_flat, ((0, 0), (0, 0), (0, HW_pad - HW)))

    const = dict(pipeline_mode=pl.Buffered(1))   # grid-invariant operands: no double buffer

    out_flat = pl.pallas_call(
        psp_fused_kernel,
        out_shape=jax.ShapeDtypeStruct((N, C_total, HW_pad), x.dtype),
        grid_spec=pltpu.PrefetchScalarGridSpec(
            num_scalar_prefetch=0,
            grid=(N,),
            in_specs=[
                pl.BlockSpec((None, C, HW_pad), lambda n: (n, 0, 0)),
                pl.BlockSpec((HW_pad, K2_PAD), lambda n: (0, 0), **const),
                pl.BlockSpec((nb * C_out, C), lambda n: (0, 0), **const),
                pl.BlockSpec((nb * C_out, K2_PAD), lambda n: (0, 0), **const),
                pl.BlockSpec((K2_PAD, HW_pad), lambda n: (0, 0), **const),
            ],
            out_specs=pl.BlockSpec((None, C_total, HW_pad), lambda n: (n, 0, 0)),
        ),
        compiler_params=pltpu.CompilerParams(dimension_semantics=("parallel",)),
    )(x_flat, pt, w_all, bias_mat, ut)

    if HW_pad != HW:
        out_flat = out_flat[:, :, :HW]
    return out_flat.reshape(N, C_total, H, W)


# Pure-JAX f32 reference for correctness checking (same math, NCHW formulation).
def ref_branch(x, ph, pw, uh, uw, w, scale, bias):
    pooled = jnp.einsum("ih,jw,nchw->ncij", ph, pw, x)
    y = jnp.einsum("oc,ncij->noij", w, pooled)
    y = jax.nn.relu(y * scale.reshape(1, -1, 1, 1) + bias.reshape(1, -1, 1, 1))
    return jnp.einsum("hi,wj,noij->nohw", uh, uw, y)


if __name__ == "__main__":
    # NOTE: toy shapes exercise correctness only; any timing here is pipeline/step
    # overhead, not the MXU path that matters at PSPNet scale.
    key = jax.random.PRNGKey(0)
    N, C_in, H, W = 2, 8, 16, 16
    C_out = 4
    eps = 1e-5

    keys = jax.random.split(key, 1 + 4 * 5)
    x = jax.random.normal(keys[0], (N, C_in, H, W), jnp.float32)

    params = []
    for i in range(4):
        kw, kg, kb, km, kv = keys[1 + i * 5: 1 + (i + 1) * 5]
        w = 0.1 * jax.random.normal(kw, (C_out, C_in), jnp.float32)        # Conv2d 1x1, no bias
        gamma = 1.0 + 0.1 * jax.random.normal(kg, (C_out,), jnp.float32)   # BN weight
        beta = 0.1 * jax.random.normal(kb, (C_out,), jnp.float32)          # BN bias
        mean = 0.1 * jax.random.normal(km, (C_out,), jnp.float32)          # running_mean
        var = jnp.abs(jax.random.normal(kv, (C_out,), jnp.float32)) + 0.5  # running_var
        s = gamma / jnp.sqrt(var + eps)
        scale = s.reshape(C_out, 1)
        bias = (beta - mean * s).reshape(C_out, 1)
        params.append((w, scale, bias))

    out = pyramid_pooling(x, params)
    out = jax.block_until_ready(out)
    assert out.shape == (N, C_in + 4 * C_out, H, W), out.shape

    # Identity rows are copied in f32 inside the kernel -> bit-exact.
    assert jnp.array_equal(out[:, :C_in], x)

    # Branch rows vs. plain-JAX f32 reference (kernel uses bf16 MXU operands with
    # f32 accumulation, so tolerance is ~1e-2).
    for idx, k in enumerate((1, 2, 3, 6)):
        ph = jnp.asarray(adaptive_avg_matrix(k, H))
        pw = jnp.asarray(adaptive_avg_matrix(k, W))
        uh = jnp.asarray(bilinear_up_matrix(H, k))
        uw = jnp.asarray(bilinear_up_matrix(W, k))
        w, scale, bias = params[idx]
        ref = ref_branch(x, ph, pw, uh, uw, w, scale, bias)
        got = out[:, C_in + idx * C_out: C_in + (idx + 1) * C_out]
        np.testing.assert_allclose(np.asarray(got), np.asarray(ref), rtol=1e-2, atol=1e-2)

    print("KERNEL_OK")
</pallas_src>

<mosaic_0001>
module attributes {stable_mosaic.version = 11 : i64} {
  func.func @psp_fused_kernel(%arg0: i32, %arg1: memref<1x8x256xf32, #tpu.memory_space<vmem>>, %arg2: memref<256x128xbf16, #tpu.memory_space<vmem>>, %arg3: memref<16x8xbf16, #tpu.memory_space<vmem>>, %arg4: memref<16x128xf32, #tpu.memory_space<vmem>>, %arg5: memref<128x256xbf16, #tpu.memory_space<vmem>>, %arg6: memref<1x24x256xf32, #tpu.memory_space<vmem>>) attributes {dimension_semantics = [#tpu.dimension_semantics<parallel>], iteration_bounds = array<i64: 2>, scalar_prefetch = 0 : i64, scratch_operands = 0 : i64, tpu.core_type = #tpu.core_type<tc>, window_params = [{transform_indices = @transform_0, window_bounds = array<i64: 1, 8, 256>}, {pipeline_mode = #tpu.pipeline_mode<synchronous>, transform_indices = @transform_1, window_bounds = array<i64: 256, 128>}, {pipeline_mode = #tpu.pipeline_mode<synchronous>, transform_indices = @transform_2, window_bounds = array<i64: 16, 8>}, {pipeline_mode = #tpu.pipeline_mode<synchronous>, transform_indices = @transform_3, window_bounds = array<i64: 16, 128>}, {pipeline_mode = #tpu.pipeline_mode<synchronous>, transform_indices = @transform_4, window_bounds = array<i64: 128, 256>}, {transform_indices = @transform_5, window_bounds = array<i64: 1, 24, 256>}]} {
    %c0 = arith.constant 0 : index
    %c0_0 = arith.constant 0 : index
    %c0_1 = arith.constant 0 : index
    %0 = vector.load %arg1[%c0, %c0_0, %c0_1] : memref<1x8x256xf32, #tpu.memory_space<vmem>>, vector<1x8x256xf32>
    %1 = vector.shape_cast %0 : vector<1x8x256xf32> to vector<8x256xf32>
    %c0_2 = arith.constant 0 : index
    %c0_3 = arith.constant 0 : index
    %c0_4 = arith.constant 0 : index
    %2 = vector.load %arg6[%c0_2, %c0_3, %c0_4] : memref<1x24x256xf32, #tpu.memory_space<vmem>>, vector<1x8x256xf32>
    %3 = vector.shape_cast %2 : vector<1x8x256xf32> to vector<8x256xf32>
    %4 = vector.shape_cast %1 : vector<8x256xf32> to vector<1x8x256xf32>
    tpu.vector_store %arg6[%c0_2, %c0_3, %c0_4], %4 {strides = array<i32>} : memref<1x24x256xf32, #tpu.memory_space<vmem>>, vector<1x8x256xf32>,
    %5 = arith.truncf %1 : vector<8x256xf32> to vector<8x256xbf16>
    %c0_5 = arith.constant 0 : index
    %c0_6 = arith.constant 0 : index
    %6 = vector.load %arg2[%c0_5, %c0_6] : memref<256x128xbf16, #tpu.memory_space<vmem>>, vector<256x128xbf16>
    %cst = arith.constant dense<0.000000e+00> : vector<8x128xf32>
    %7 = tpu.matmul %5, %6, %cst {dimension_numbers = #tpu.dot_dimension_numbers<[1], [0], [0], [1], [0, 0, 1, 1], [], []>} : vector<8x256xbf16>, vector<256x128xbf16>, vector<8x128xf32> -> vector<8x128xf32>
    %c0_7 = arith.constant 0 : index
    %c0_8 = arith.constant 0 : index
    %8 = vector.load %arg3[%c0_7, %c0_8] : memref<16x8xbf16, #tpu.memory_space<vmem>>, vector<16x8xbf16>
    %9 = arith.truncf %7 : vector<8x128xf32> to vector<8x128xbf16>
    %cst_9 = arith.constant dense<0.000000e+00> : vector<16x128xf32>
    %10 = tpu.matmul %8, %9, %cst_9 {dimension_numbers = #tpu.dot_dimension_numbers<[1], [0], [0], [1], [0, 0, 1, 1], [], []>} : vector<16x8xbf16>, vector<8x128xbf16>, vector<16x128xf32> -> vector<16x128xf32>
    %c0_10 = arith.constant 0 : index
    %c0_11 = arith.constant 0 : index
    %11 = vector.load %arg4[%c0_10, %c0_11] : memref<16x128xf32, #tpu.memory_space<vmem>>, vector<16x128xf32>
    %12 = arith.addf %10, %11 : vector<16x128xf32>
    %cst_12 = arith.constant 0.000000e+00 : f32
    %13 = vector.broadcast %cst_12 : f32 to vector<16x128xf32>
    %14 = arith.maximumf %12, %13 : vector<16x128xf32>
    %15 = arith.truncf %14 : vector<16x128xf32> to vector<16x128xbf16>
    %c0_13 = arith.constant 0 : index
    %c0_14 = arith.constant 0 : index
    %16 = vector.load %arg5[%c0_13, %c0_14] : memref<128x256xbf16, #tpu.memory_space<vmem>>, vector<128x256xbf16>
    %cst_15 = arith.constant dense<0.000000e+00> : vector<16x256xf32>
    %17 = tpu.matmul %15, %16, %cst_15 {dimension_numbers = #tpu.dot_dimension_numbers<[1], [0], [0], [1], [0, 0, 1, 1], [], []>} : vector<16x128xbf16>, vector<128x256xbf16>, vector<16x256xf32> -> vector<16x256xf32>
    %c0_16 = arith.constant 0 : index
    %c8 = arith.constant 8 : index
    %c0_17 = arith.constant 0 : index
    %18 = vector.load %arg6[%c0_16, %c8, %c0_17] : memref<1x24x256xf32, #tpu.memory_space<vmem>>, vector<1x16x256xf32>
    %19 = vector.shape_cast %18 : vector<1x16x256xf32> to vector<16x256xf32>
    %20 = vector.shape_cast %17 : vector<16x256xf32> to vector<1x16x256xf32>
    tpu.vector_store %arg6[%c0_16, %c8, %c0_17], %20 {strides = array<i32>} : memref<1x24x256xf32, #tpu.memory_space<vmem>>, vector<1x16x256xf32>,
    return
  }
  func.func @transform_0(%arg0: i32) -> (i32, i32, i32) {
    %c0_i32 = arith.constant 0 : i32
    %c0_i32_0 = arith.constant 0 : i32
    %c0_i32_1 = arith.constant 0 : i32
    return %arg0, %c0_i32, %c0_i32_0 : i32, i32, i32
  }
  func.func @transform_1(%arg0: i32) -> (i32, i32) {
    %c0_i32 = arith.constant 0 : i32
    %c0_i32_0 = arith.constant 0 : i32
    %c0_i32_1 = arith.constant 0 : i32
    return %c0_i32, %c0_i32_0 : i32, i32
  }
  func.func @transform_2(%arg0: i32) -> (i32, i32) {
    %c0_i32 = arith.constant 0 : i32
    %c0_i32_0 = arith.constant 0 : i32
    %c0_i32_1 = arith.constant 0 : i32
    return %c0_i32, %c0_i32_0 : i32, i32
  }
  func.func @transform_3(%arg0: i32) -> (i32, i32) {
    %c0_i32 = arith.constant 0 : i32
    %c0_i32_0 = arith.constant 0 : i32
    %c0_i32_1 = arith.constant 0 : i32
    return %c0_i32, %c0_i32_0 : i32, i32
  }
  func.func @transform_4(%arg0: i32) -> (i32, i32) {
    %c0_i32 = arith.constant 0 : i32
    %c0_i32_0 = arith.constant 0 : i32
    %c0_i32_1 = arith.constant 0 : i32
    return %c0_i32, %c0_i32_0 : i32, i32
  }
  func.func @transform_5(%arg0: i32) -> (i32, i32, i32) {
    %c0_i32 = arith.constant 0 : i32
    %c0_i32_0 = arith.constant 0 : i32
    %c0_i32_1 = arith.constant 0 : i32
    return %arg0, %c0_i32, %c0_i32_0 : i32, i32, i32
  }
}

</mosaic_0001>

<bundles_post_ra>
// kernel: tpu_custom_call.1
= control target key start
LH: loop header
LB: loop body
LE: loop exit
PB: predicated region body
PF: predicated region fallthrough
CT: control target
= control target key end

     0   :  { %10 = vsyncpa [#allocation3], 0  ;;  %s1406_s0 = inlined_call_operand.hbm [shape: f32[2,8,256], index: 0, kind: input, shape index: {}]   ;;  %s1407_s1 = inlined_call_operand.hbm [shape: bf16[256,128], index: 1, kind: input, shape index: {}]   ;;  %s1408_s2 = inlined_call_operand.vmem [shape: bf16[16,8], index: 2, kind: input, shape index: {}]   ;;  %s1409_s3 = inlined_call_operand.vmem [shape: f32[16,128], index: 3, kind: input, shape index: {}]   ;;  %s1410_s4 = inlined_call_operand.hbm [shape: bf16[128,256], index: 4, kind: input, shape index: {}]   ;;  %s1411_s5 = inlined_call_operand.hbm [shape: f32[2,24,256], index: 5, kind: output, shape index: {}]  }
   0x1   :  { %12 = vsyncpa [#allocation3 + $0x1], 0 }
   0x2   :  { %13 = vsyncpa [#allocation6], 0 }
   0x3   :  { %14 = vsyncpa [#allocation4], 0 }
   0x4   :  { %16 = vsyncpa [#allocation4 + $0x1], 0  ;;  %s1156_s18 = smov 0   ;;  %s1158_s19 = smov 0  }
   0x5   :  { %s1160_s20 = smov 0   ;;  %s1162_s21 = smov 0  }
   0x6 LB: > { %s1177_s22 = sadd.s32 4294967295, %s1111_s21   ;;  %s756_s23 = sadd.s32 4294967294, %s1111_s21   ;;  %s1111_s21 = sphi %s1162_s21, %s1431_s21   ;;  %s1107_s20 = sphi %s1160_s20, %s1430_s20   ;;  %s1103_s19 = sphi %s1158_s19, %s1429_s19   ;;  %s1099_s18 = sphi %s1156_s18, %s1428_s18  }
   0x7   : > { %p42_p0 = scmp.ne.s32.totalorder %s1103_s19, %s1099_s18  ;;  %p1412_p1 = scmp.eq.s32.totalorder %s1177_s22, 0 }
   0x8   : > { %p156_p3 = scmp.eq.s32.totalorder %s756_s23, 1  ;;  %p757_p5 = scmp.ge.s32.totalorder %s1111_s21, 1 }
   0x9   : > { %p1186_p4 = por %p1412_p1, %p42_p0  ;;  %p163_p7 = scmp.lt.s32.totalorder %s1111_s21, 3 }
   0xa   : > { %p1191_p6 = por %p156_p3, %p42_p0  ;;  %s1113_s27 = smov [#allocation5]  }
   0xb   : > { %s1415_s24 = scalar_select %p1186_p4, 1, 0 }
   0xc   : > { %s1416_s25 = scalar_select %p1191_p6, 1, 0 }
   0xd   : > { %p1196_p8 = pnand %p757_p5, %p163_p7  ;;  %s175_s28 = sshll.u32 %s1113_s27, 4  ;;  %s1200_s28 = int_to_ptr.vmem [resolvable:$true] %s175_s28 }
   0xe   : > { %s1114_s30 = smov [#allocation7]   ;;  %s955_s9 = scalar_lea.hbm %s1407_s1, 2048 }
   0xf   : > { %p850_p9 = pneg %p1196_p8  ;;  %s194_s6 = sshll.u32 %s1114_s30, 4  ;;  %s1211_s6 = int_to_ptr.vmem [resolvable:$true] %s194_s6 }
  0x10   : > { %p956_p12 = scmp.ne.s32.totalorder %s1407_s1, %s955_s9  ;;  %p962_p5 = scmp.lt.u32.totalorder %s955_s9, %s1407_s1 }
  0x11   : > { %p1207_p11 = pnand %p850_p9, %p1412_p1 }
  0x13   : > { %p957_p13 = pneg %p1207_p11 }
  0x15   : > { %p958_p0 = pnand %p957_p13, %p956_p12 }
  0x17   : > { %p959_p3 = pneg %p958_p0 }
  0x19   : > { %p964_p7 = pnand %p962_p5, %p959_p3 }
  0x1b   : > { %967 = shalt.err (!%p964_p7)
}
  0x1c   : > { %s968_s14 = scalar_lea.vmem %s1200_s28, 2048  ;;  %p976_p2 = scmp.lt.s32.totalorder %s1200_s28, %s1200_s28 }
  0x1d   : > { %p969_p9 = scmp.ne.s32.totalorder %s1200_s28, %s968_s14  ;;  %p977_p12 = scmp.lt.s32.totalorder %s968_s14, %s968_s14 }
  0x1f   : > { %p971_p10 = pnand %p969_p9, %p957_p13  ;;  %p978_p0 = por %p977_p12, %p976_p2 }
  0x21   : > { %p972_p1 = pneg %p971_p10 }
  0x23   : > { %p979_p6 = pnand %p978_p0, %p972_p1 }
  0x25   : > { %982 = shalt.err (!%p979_p6)
}
  0x26   : > { %s1115_s15 = smov 64   ;;  %s1116_s16 = smov 4  }
  0x27   : > { %853 = dma.hbm_to_vmem [thread:$0]  (!%p1207_p11), %s1407_s1, 2048, %s1200_s28, [#allocation6], %s1115_s15, %s1115_s15, %s1116_s16  }
  0x28   : > { %s983_s7 = scalar_lea.hbm %s1410_s4, 2048 }
  0x29   : > { %p984_p2 = scmp.ne.s32.totalorder %s1410_s4, %s983_s7  ;;  %p990_p10 = scmp.lt.u32.totalorder %s983_s7, %s1410_s4 }
  0x2b   : > { %p986_p1 = pnand %p984_p2, %p957_p13 }
  0x2d   : > { %p987_p6 = pneg %p986_p1 }
  0x2f   : > { %p992_p3 = pnand %p990_p10, %p987_p6 }
  0x31   : > { %995 = shalt.err (!%p992_p3)
}
  0x32   : > { %s996_s28 = scalar_lea.vmem %s1211_s6, 2048  ;;  %p1004_p12 = scmp.lt.s32.totalorder %s1211_s6, %s1211_s6 }
  0x33   : > { %p997_p5 = scmp.ne.s32.totalorder %s1211_s6, %s996_s28  ;;  %p1005_p0 = scmp.lt.s32.totalorder %s996_s28, %s996_s28 }
  0x35   : > { %p999_p7 = pnand %p997_p5, %p957_p13  ;;  %p1006_p2 = por %p1005_p0, %p1004_p12 }
  0x37   : > { %p1000_p9 = pneg %p999_p7 }
  0x39   : > { %p1007_p1 = pnand %p1006_p2, %p1000_p9 }
  0x3b   : > { %1010 = shalt.err (!%p1007_p1)
}
  0x3c   : > { %s1117_s12 = smov 128   ;;  %s1118_s13 = smov 8  }
  0x3d   : > { %856 = dma.hbm_to_vmem [thread:$0]  (!%p1207_p11), %s1410_s4, 2048, %s1211_s6, [#allocation6], %s1117_s12, %s1117_s12, %s1118_s13  }
  0x3e   : > { %s1266_s16 = sadd.s32 1, %s1111_s21   ;;  %s29_s23 = sadd.s32 1, %s1107_s20 }
  0x3f   : > { %s26_s17 = ssub.s32 %s1111_s21, %s1266_s16  ;;  %p36_p6 = scmp.ne.s32.totalorder %s1107_s20, %s1103_s19 }
  0x40   : > { %p27_p13 = scmp.eq.s32.totalorder %s26_s17, 0  ;;  %p37_p10 = scmp.eq.s32.totalorder %s1111_s21, 0 }
  0x41   : > { %p1419_p5 = scmp.eq.s32.totalorder %s1177_s22, 1  ;;  %p867_p9 = scmp.lt.s32.totalorder %s1111_s21, 2 }
  0x42   : > { %s1275_s27 = scalar_select %p27_p13, %s1107_s20, %s29_s23  }
  0x43   : > { %p38_p3 = por %p37_p10, %p36_p6  ;;  %p1279_p7 = por %p1419_p5, %p36_p6 }
  0x44   : > { %s208_s29 = sand.u32 1, %s1107_s20   ;;  %s805_s6 = sshll.u32 %s1111_s21, 8 }
  0x45   : > { %s1420_s30 = scalar_select %p1279_p7, 1, 0 }
  0x46   : > { %s761_s7 = sshll.u32 %s208_s29, 4  ;;  %s1289_s10 = scalar_lea.hbm %s1406_s0, %s805_s6 }
  0x47   : > { %s212_s11 = scalar_lea.vmem [#allocation2], %s761_s7  ;;  %p1293_p11 = pnand %p867_p9, %p38_p3 }
  0x48   : > { %s220_s28 = sshll.u32 %s212_s11, 4  ;;  %s209_s13 = scalar_lea.sflag [#allocation3], %s208_s29  ;;  %s1291_s28 = int_to_ptr.vmem [resolvable:$true] %s220_s28 }
  0x49   : > { %s1011_s14 = scalar_lea.hbm %s1289_s10, 256  ;;  %p1013_p0 = pneg %p1293_p11 }
  0x4a   : > { %p1012_p12 = scmp.ne.s32.totalorder %s1289_s10, %s1011_s14  ;;  %s1016_s23 = scalar_lea.hbm %s1406_s0, 512 }
  0x4b   : > { %p1017_p13 = scmp.lt.u32.totalorder %s1289_s10, %s1406_s0  ;;  %p1018_p6 = scmp.lt.u32.totalorder %s1016_s23, %s1011_s14 }
  0x4c   : > { %p1014_p2 = pnand %p1013_p0, %p1012_p12  ;;  %p1020_p3 = scmp.lt.u32.totalorder %s1011_s14, %s1289_s10 }
  0x4d   : > { %p1019_p10 = por %p1018_p6, %p1017_p13 }
  0x4e   : > { %p1015_p1 = pneg %p1014_p2 }
  0x4f   : > { %p1021_p5 = por %p1020_p3, %p1019_p10 }
  0x51   : > { %p1022_p9 = pnand %p1021_p5, %p1015_p1 }
  0x53   : > { %1025 = shalt.err (!%p1022_p9)
}
  0x54   : > { %s1026_s29 = scalar_lea.vmem %s1291_s28, 256  ;;  %s1119_s8 = smov [#allocation2]  }
  0x55   : > { %p1027_p12 = scmp.ne.s32.totalorder %s1291_s28, %s1026_s29  ;;  %s1031_s9 = sshll.u32 %s1119_s8, 4  ;;  %s1032_s9 = int_to_ptr.vmem [resolvable:$false] %s1031_s9 }
  0x56   : > { %s1033_s11 = scalar_lea.vmem %s1032_s9, 512  ;;  %p1034_p4 = scmp.lt.s32.totalorder %s1291_s28, %s1032_s9 }
  0x57   : > { %p1029_p2 = pnand %p1027_p12, %p1013_p0  ;;  %p1035_p13 = scmp.lt.s32.totalorder %s1033_s11, %s1026_s29 }
  0x59   : > { %p1030_p7 = pneg %p1029_p2  ;;  %p1036_p6 = por %p1035_p13, %p1034_p4 }
  0x5b   : > { %p1037_p10 = pnand %p1036_p6, %p1030_p7 }
  0x5d   : > { %1040 = shalt.err (!%p1037_p10)
}
  0x5e   : > { %860 = dma.hbm_to_vmem [thread:$0]  (!%p1293_p11), %s1289_s10, 256, %s1291_s28, %s209_s13  }
  0x5f   : > { %229 = sbr.rel (%p1196_p8) target bundleno = 810 (0x32a), region = 40  ;;  %s1325_s14 = sand.u32 (!%p1196_p8), 1, %s1103_s19  }
  0x60   : > { %s765_s15 = sshll.u32 (!%p1196_p8), %s1325_s14, 4  ;;  %s232_s17 = scalar_lea.sflag (!%p1196_p8), [#allocation3], %s1325_s14 }
  0x61   : > { %s235_s23 = scalar_lea.vmem (!%p1196_p8), [#allocation2], %s765_s15  ;;  %p1422_p4 = scmp.ne.s32.totalorder (!%p1196_p8), %s1415_s24, 0 }
  0x66   : > { %1086 = dma.done.wait (%p1422_p4), %s232_s17, 256  }
  0x67   : > { %1088 = vsyncadd (%p1422_p4), %s232_s17, 4294967040  ;;  %p1423_p7 = scmp.eq.s32.totalorder %s1177_s22, 0 }
  0x69   : > { %1090 = dma.done.wait (%p1423_p7), [#allocation6], 4096   ;;  %p1424_p11 = pmov %p1423_p7 }
  0x6a   : > { %v914_v0 = vld [vmem:[#allocation5 + $0x40] sm:$0xff]   ;;  %v916_v2 = vld [vmem:[#allocation5 + $0x48] sm:$0xff]   ;;  %v918_v4 = vld [vmem:[#allocation5 + $0x50] sm:$0xff]   ;;  %s836_s24 = smul.u32 48, %s1325_s14  ;;  %v1120_v20 = vmov 0.0   ;;  %vm1121_vm0 = vmmov 0  }
  0x6b   : > { %1092 = vsyncadd (%p1424_p11), [#allocation6], 4294963200  ;;  %v915_v1 = vld [vmem:[#allocation5] sm:$0xff]   ;;  %806 = vmatprep.subr.bf16.mxu0 %v914_v0  ;;  %v917_v3 = vld [vmem:[#allocation5 + $0x8] sm:$0xff]   ;;  %830 = vmatprep.subr.bf16.mxu1 %v1120_v20  ;;  %vm459_vm1 = vcmask 1043456   ;;  %vm455_vm2 = vcmask 64512  }
  0x6c   : > { %807 = vmatpush3.bf16.msra.mxu0 %v915_v1  ;;  %v919_v5 = vld [vmem:[#allocation5 + $0x10] sm:$0xff]   ;;  %v920_v6 = vld [vmem:[#allocation5 + $0x58] sm:$0xff]   ;;  %v922_v8 = vld [vmem:[#allocation5 + $0x60] sm:$0xff]   ;;  %s1338_s26 = scalar_lea.vmem [#allocation8], %s836_s24  ;;  %832 = vmatprep.mubr.msk.bf16.mxu1 %vm1121_vm0, %v1120_v20  ;;  %v1122_v45 = vmov 0   ;;  %s837_s8 = smul.u32 768, %s1177_s22 }
  0x6d   : > { %808 = vmatprep.subr.bf16.mxu0 %v916_v2  ;;  %v921_v7 = vld [vmem:[#allocation5 + $0x18] sm:$0xff]   ;;  %v923_v9 = vld [vmem:[#allocation5 + $0x20] sm:$0xff]   ;;  %v924_v10 = vld [vmem:[#allocation5 + $0x68] sm:$0xff]   ;;  %s664_s29 = sshll.u32 %s1338_s26, 4  ;;  %s651_s17 = scalar_lea.sflag [#allocation4], %s1325_s14  ;;  %s1353_s29 = int_to_ptr.vmem [resolvable:$true] %s664_s29 }
  0x6e   : > { %v272_v11 = vld [vmem:[%s235_s23 + $0x8] sm:$0xff]  ;;  %v271_v12 = vld [vmem:[%s235_s23] sm:$0xff]  ;;  %s1359_s15 = scalar_lea.hbm %s1411_s5, %s837_s8  ;;  %s1041_s22 = scalar_lea.vmem %s1353_s29, 768 }
  0x6f   : > { %v925_v13 = vld [vmem:[#allocation5 + $0x28] sm:$0xff]   ;;  %274 = vst [vmem:[%s1338_s26 + $0x8] sm:$0xff] %v272_v11  ;;  %v276_v14 = vpack.c.bf16 %v272_v11, %v272_v11  ;;  %273 = vst [vmem:[%s1338_s26] sm:$0xff] %v271_v12  ;;  %v926_v15 = vld [vmem:[#allocation5 + $0x70] sm:$0xff]   ;;  %v275_v19 = vpack.c.bf16 %v271_v12, %v271_v12  ;;  %p1042_p8 = scmp.ne.s32.totalorder %s1353_s29, %s1041_s22  ;;  %p1425_p0 = scmp.ne.s32.totalorder %s1420_s30, 0 }
  0x70   : > { %809 = vmatpush3.bf16.msra.mxu0 %v917_v3  ;;  %v927_v16 = vld [vmem:[#allocation5 + $0x30] sm:$0xff]   ;;  %v928_v17 = vld [vmem:[#allocation5 + $0x78] sm:$0xff]   ;;  %v933_v27 = vld [vmem:[#allocation7 + $0x4] ss:$8 sps:$4 sm:$0xff]   ;;  %s1123_s23 = smov [#allocation8]  }
  0x71   : > { %810 = vmatprep.subr.bf16.mxu0 %v918_v4  ;;  %437 = vmatprep.mubr.bf16.mxu0 %v276_v14  ;;  %v929_v18 = vld [vmem:[#allocation5 + $0x38] sm:$0xff]   ;;  %v930_v29 = vld [vmem:[%s1408_s2] sm:$0xff]   ;;  %v449_v48 = vld [vmem:[%s1409_s3 + $0x8] sm:$0xff]  ;;  %p1043_p1 = pnand %p1042_p8, %p1425_p0  ;;  %s1045_s24 = sshll.u32 %s1123_s23, 4  ;;  %s1046_s24 = int_to_ptr.vmem [resolvable:$false] %s1045_s24 }
  0x72   : > { %v931_v30 = vld [vmem:[#allocation7] ss:$8 sps:$4 sm:$0xff]   ;;  %v936_v31 = vld [vmem:[#allocation7 + $0x14] ss:$8 sps:$4 sm:$0xff]   ;;  %v934_v32 = vld [vmem:[#allocation7 + $0x10] ss:$8 sps:$4 sm:$0xff]   ;;  %p1048_p5 = scmp.lt.s32.totalorder %s1353_s29, %s1046_s24 }
  0x73   : > { %v939_v33 = vld [vmem:[#allocation7 + $0x24] ss:$8 sps:$4 sm:$0xff]   ;;  %v937_v34 = vld [vmem:[#allocation7 + $0x20] ss:$8 sps:$4 sm:$0xff]   ;;  %v942_v35 = vld [vmem:[#allocation7 + $0x34] ss:$8 sps:$4 sm:$0xff]   ;;  %p1044_p3 = pneg %p1043_p1 }
  0x74   : > { %811 = vmatpush3.bf16.msra.mxu0 %v919_v5  ;;  %v940_v36 = vld [vmem:[#allocation7 + $0x30] ss:$8 sps:$4 sm:$0xff]   ;;  %v945_v37 = vld [vmem:[#allocation7 + $0x44] ss:$8 sps:$4 sm:$0xff]   ;;  %v943_v38 = vld [vmem:[#allocation7 + $0x40] ss:$8 sps:$4 sm:$0xff]  }
  0x75   : > { %812 = vmatprep.subr.bf16.mxu0 %v920_v6  ;;  %v948_v39 = vld [vmem:[#allocation7 + $0x54] ss:$8 sps:$4 sm:$0xff]   ;;  %v946_v40 = vld [vmem:[#allocation7 + $0x50] ss:$8 sps:$4 sm:$0xff]   ;;  %v951_v41 = vld [vmem:[#allocation7 + $0x64] ss:$8 sps:$4 sm:$0xff]  }
  0x76   : > { %v949_v42 = vld [vmem:[#allocation7 + $0x60] ss:$8 sps:$4 sm:$0xff]   ;;  %v954_v43 = vld [vmem:[#allocation7 + $0x74] ss:$8 sps:$4 sm:$0xff]   ;;  %v952_v44 = vld [vmem:[#allocation7 + $0x70] ss:$8 sps:$4 sm:$0xff]  }
  0x77   : > { %v448_v46 = vld [vmem:[%s1409_s3] sm:$0xff]  ;;  %s1047_s10 = scalar_lea.vmem %s1046_s24, 1536 }
  0x78   : > { %813 = vmatpush3.bf16.msra.mxu0 %v921_v7  ;;  %p1049_p9 = scmp.lt.s32.totalorder %s1047_s10, %s1041_s22 }
  0x79   : > { %814 = vmatprep.subr.bf16.mxu0 %v922_v8 }
  0x7a   : > { %p1050_p12 = por %p1049_p9, %p1048_p5 }
  0x7c   : > { %815 = vmatpush3.bf16.msra.mxu0 %v923_v9  ;;  %p1051_p2 = pnand %p1050_p12, %p1044_p3 }
  0x7d   : > { %816 = vmatprep.subr.bf16.mxu0 %v924_v10 }
  0x80   : > { %817 = vmatpush3.bf16.msra.mxu0 %v925_v13 }
  0x81   : > { %818 = vmatprep.subr.bf16.mxu0 %v926_v15 }
  0x84   : > { %819 = vmatpush3.bf16.msra.mxu0 %v927_v16 }
  0x85   : > { %820 = vmatprep.subr.bf16.mxu0 %v928_v17 }
  0x88   : > { %821 = vmatpush3.bf16.msra.mxu0 %v929_v18 }
  0x8b   : > { %438 = vmatmul.mubr.bf16.vlgmr.msra.gmra.mrb[0].mxu0 %v275_v19 }
 0x15e   : > { %v822_v21 = vpop.f32.mrb[0].mxu0 }
 0x15f   : > { %v823_v22 = vpop.f32.mrb[1].mxu0 }
 0x160   : > { %v824_v23 = vadd.f32 %v823_v22, %v822_v21  ;;  %v825_v24 = vpop.f32.mrb[2].mxu0 }
 0x161   : > { %v826_v25 = vpop.f32.mrb[3].mxu0 }
 0x162   : > { %v447_v26 = vpack.c.bf16 %v824_v23, %v824_v23 }
 0x164   : > { %v461_v28 = vsel %vm459_vm1, %v447_v26, 0 }
 0x165   : > { %831 = vmatpush3.bf16.msra.mxu1 %v461_v28 }
 0x166   : > { %603 = vmatprep.subr.bf16.mxu1 %v933_v27 }
 0x168   : > { %833 = vmatmul.mubr.msk.bf16.vlgmr.msra.gmra.mrb[0].mxu1 %vm455_vm2, %v930_v29 }
 0x169   : > { %604 = vmatpush1.bf16.msra.mxu1 %v931_v30  ;;  %635 = vmatprep.mubr.bf16.mxu1 %v1122_v45 }
 0x16a   : > { %605 = vmatprep.subr.bf16.mxu1 %v936_v31 }
 0x16d   : > { %606 = vmatpush1.bf16.msra.mxu1 %v934_v32 }
 0x16e   : > { %607 = vmatprep.subr.bf16.mxu1 %v939_v33 }
 0x171   : > { %608 = vmatpush1.bf16.msra.mxu1 %v937_v34 }
 0x172   : > { %609 = vmatprep.subr.bf16.mxu1 %v942_v35 }
 0x175   : > { %610 = vmatpush1.bf16.msra.mxu1 %v940_v36 }
 0x176   : > { %611 = vmatprep.subr.bf16.mxu1 %v945_v37 }
 0x179   : > { %612 = vmatpush1.bf16.msra.mxu1 %v943_v38 }
 0x17a   : > { %613 = vmatprep.subr.bf16.mxu1 %v948_v39 }
 0x17d   : > { %614 = vmatpush1.bf16.msra.mxu1 %v946_v40 }
 0x17e   : > { %615 = vmatprep.subr.bf16.mxu1 %v951_v41 }
 0x181   : > { %616 = vmatpush1.bf16.msra.mxu1 %v949_v42 }
 0x182   : > { %617 = vmatprep.subr.bf16.mxu1 %v954_v43 }
 0x185   : > { %618 = vmatpush1.bf16.msra.mxu1 %v952_v44 }
 0x23b   : > { %v497_v47 = vpop.f32.mrb[0].mxu1 }
 0x23c   : > { %v498_v49 = vadd.f32 %v497_v47, %v448_v46  ;;  %v834_v50 = vpop.f32.mrb[1].mxu1 }
 0x23d   : > { %v500_v51 = vpop.f32.mrb[2].mxu1 }
 0x23e   : > { %v501_v52 = vadd.f32 %v500_v51, %v449_v48  ;;  %v835_v53 = vpop.f32.mrb[3].mxu1  ;;  %v504_v54 = vmax.f32 %v498_v49, 0.0 }
 0x240   : > { %v505_v55 = vmax.f32 %v501_v52, 0.0 }
 0x242   : > { %v506_v56 = vpack.c.bf16 %v505_v55, %v504_v54 }
 0x244   : > { %636 = vmatmul.mubr.bf16.vlgmr.msra.gmra.mrb[4].mxu1 %v506_v56 }
 0x317   : > { %v637_v57 = vpop.f32.mrb[4].mxu1 }
 0x318   : > { %646 = vst [vmem:[%s1338_s26 + $0x10] sm:$0xff] %v637_v57  ;;  %v639_v58 = vpop.f32.mrb[5].mxu1 }
 0x319   : > { %647 = vst [vmem:[%s1338_s26 + $0x18] sm:$0xff] %v639_v58  ;;  %v641_v59 = vpop.f32.mrb[6].mxu1 }
 0x31a   : > { %648 = vst [vmem:[%s1338_s26 + $0x20] sm:$0xff] %v641_v59  ;;  %v643_v60 = vpop.f32.mrb[7].mxu1 }
 0x31b   : > { %649 = vst [vmem:[%s1338_s26 + $0x28] sm:$0xff] %v643_v60 }
 0x31c   : > { %1054 = shalt.err (!%p1051_p2)
}
 0x31d   : > { %s1055_s26 = scalar_lea.hbm %s1359_s15, 768  ;;  %s1059_s13 = scalar_lea.hbm %s1411_s5, 1536 }
 0x31e   : > { %p1056_p13 = scmp.ne.s32.totalorder %s1359_s15, %s1055_s26  ;;  %p1060_p4 = scmp.lt.u32.totalorder %s1359_s15, %s1411_s5 }
 0x31f   : > { %p1061_p7 = scmp.lt.u32.totalorder %s1059_s13, %s1055_s26  ;;  %p1063_p8 = scmp.lt.u32.totalorder %s1055_s26, %s1359_s15 }
 0x320   : > { %p1057_p6 = pnand %p1056_p13, %p1425_p0 }
 0x321   : > { %p1062_p11 = por %p1061_p7, %p1060_p4 }
 0x322   : > { %p1058_p10 = pneg %p1057_p6 }
 0x323   : > { %p1064_p1 = por %p1063_p8, %p1062_p11 }
 0x325   : > { %p1065_p3 = pnand %p1064_p1, %p1058_p10 }
 0x327   : > { %1068 = shalt.err (!%p1065_p3)
}
 0x328   : > { %s1124_s8 = smov 256   ;;  %s1125_s9 = smov 16  }
 0x329   : > { %848 = dma.vmem_to_hbm [thread:$0]  (%p1425_p0), %s1353_s29, 768, %s1359_s15, %s651_s17, %s1124_s8, %s1124_s8, %s1125_s9  }
 0x32a PF: > { %s679_s11 = sand.u32 1, %s1099_s18   ;;  %p1426_p5 = scmp.ne.s32.totalorder %s1416_s25, 0 }
 0x32b   : > { %p1427_p9 = scmp.ge.s32.totalorder %s1111_s21, 2  ;;  %s680_s22 = scalar_lea.sflag [#allocation4], %s679_s11 }
 0x32d   : > { %p862_p12 = pnand %p1427_p9, %p1426_p5 }
 0x32f   : > { %1094 = dma.done.wait (!%p862_p12), %s680_s22, 768  }
 0x330   : > { %1096 = vsyncadd (!%p862_p12), %s680_s22, 4294966528  ;;  %p19_p2 = scmp.ge.s32.totalorder %s1266_s16, 4   ;;  %s1428_s18 = smov %s1103_s19 }
 0x331   : > { %s1429_s19 = smov %s1107_s20  ;;  %s1430_s20 = smov %s1275_s27 }
 0x332   : > { %s1431_s21 = smov %s1266_s16  ;;  %21 = sbr.rel (!%p19_p2) target bundleno = 6 (0x6), region = 93 }
 0x339   :  { %685 = vsyncpa [#allocation3], 1 }
 0x33a   :  { %687 = vsyncpa [#allocation3 + $0x1], 1 }
 0x33b   :  { %688 = vsyncpa [#allocation6], 1 }
 0x33c   :  { %689 = vsyncpa [#allocation4], 1 }
 0x33d   :  { %691 = vsyncpa [#allocation4 + $0x1], 1 }

</bundles_post_ra>
